<compile_context>
chip_gen: v7x
topology: tpu7x:2x2x1
jax: 0.10.0
libtpu: 0.0.40
codegen_flags: <defaults>
</compile_context>

<pallas_src>
import jax
import jax.numpy as jnp
from jax.experimental import pallas as pl
from jax.experimental.pallas import tpu as pltpu


# ---------------------------------------------------------------------------
# Kernel: one affine map per batch tile.   out = x @ M + b
# ---------------------------------------------------------------------------
def _folded_affine_kernel(x_ref, m_ref, b_ref, out_ref):
    # x tile: (tile, D1) in the stream dtype (== M dtype); M: (D1, D2);
    # b: (1, D2) f32.  MXU matmul with f32 accumulation; bias add on the VPU
    # stays in f32 (safe on v5e, which has no bf16 VALU).
    acc = jnp.dot(x_ref[...], m_ref[...], preferred_element_type=jnp.float32)
    out_ref[...] = (acc + b_ref[...]).astype(out_ref.dtype)


# ---------------------------------------------------------------------------
# Wrapper
# ---------------------------------------------------------------------------
_VMEM_STREAM_BUDGET = 20 << 20   # budget for double-buffered x + out tiles
_VMEM_LIMIT_BYTES = 28 << 20     # explicit scoped-VMEM limit (v5e default 16 MiB,
                                 # v6e/v7x default 32 MiB; 28 MiB is safe on all)


def _round_up(n, m):
    return pl.cdiv(n, m) * m


def dimension_reduction(x, mat, bias, *, tile_b=None, out_dtype=None):
    """out = x @ mat + bias, batch-tiled on the MXU.

    x:    (B, D1)
    mat:  (D1, D2) folded weight (f32 or bf16) -- see fold_params()
    bias: (1, D2) f32 folded bias
    """
    B, D1 = x.shape
    D1m, D2 = mat.shape
    assert D1 == D1m, (D1, D1m)
    out_dtype = x.dtype if out_dtype is None else out_dtype

    # Stream x in the same dtype as the folded weight: when mat is bf16 this
    # halves the dominant HBM read stream of this bandwidth-bound kernel and
    # removes a tile-sized VPU cast per grid step.
    x_stream = x if x.dtype == mat.dtype else x.astype(mat.dtype)

    x_bytes = jnp.dtype(x_stream.dtype).itemsize
    out_bytes = jnp.dtype(out_dtype).itemsize

    # Sublane alignment of the batch dim of the x / out blocks.
    sub = 8
    if x_bytes < 4 or out_bytes < 4:
        sub = 16

    # Default tile: big enough that the ~0.35us per-step overhead is noise.
    if tile_b is None:
        tile_b = 2048 if x_bytes >= 4 else 4096

    # Cap so double-buffered x + out tiles fit the VMEM budget (v7x-safe).
    per_row = 2 * (D1 * x_bytes + D2 * out_bytes)
    vmem_cap_rows = max(sub, ((_VMEM_STREAM_BUDGET // per_row) // sub) * sub)

    # Guarantee >=2 grid steps whenever the batch allows it (v7x: 2 TCs share
    # the "parallel" axis; a 1-step grid would idle one core).
    two_step_rows = int(_round_up(pl.cdiv(B, 2), sub))

    tile = int(min(int(tile_b), int(vmem_cap_rows), two_step_rows))
    tile = max(sub, (tile // sub) * sub)

    grid = (pl.cdiv(B, tile),)   # partial last block handled by Pallas:
                                 # OOB input rows are padded, OOB output rows
                                 # are masked on writeback (row-independent op).

    # TODO(synk): if xprof still shows exposed input DMA on v6e/v7x, try
    # pipeline_mode=pl.Buffered(3) on the x BlockSpec only (small win).
    out = pl.pallas_call(
        _folded_affine_kernel,
        out_shape=jax.ShapeDtypeStruct((B, D2), out_dtype),
        grid_spec=pltpu.PrefetchScalarGridSpec(
            num_scalar_prefetch=0,
            grid=grid,
            in_specs=[
                pl.BlockSpec((tile, D1), lambda i: (i, 0)),   # x, batch-tiled
                pl.BlockSpec((D1, D2), lambda i: (0, 0)),     # folded weight M
                pl.BlockSpec((1, D2), lambda i: (0, 0)),      # folded bias
            ],
            out_specs=pl.BlockSpec((tile, D2), lambda i: (i, 0)),
        ),
        compiler_params=pltpu.CompilerParams(
            dimension_semantics=("parallel",),
            vmem_limit_bytes=_VMEM_LIMIT_BYTES,
        ),
    )(x_stream, mat, bias)
    return out


# ---------------------------------------------------------------------------
# One-time folding of the 5-matmul pipeline into (M, bias).  Call this once
# per parameter set (NOT per forward call) and reuse the result.
# ---------------------------------------------------------------------------
def fold_params(params, compute_dtype=jnp.float32):
    w1e, w1d = params["w1e_t"], params["w1d_t"]
    w2e = params["w2e_t"]
    w3e, w3d = params["w3e_t"], params["w3d_t"]
    d1, d2 = w2e.shape
    p1 = jnp.eye(d1, dtype=jnp.float32) - w1e @ w1d          # (D1, D1)
    p3 = jnp.eye(d2, dtype=jnp.float32) - w3e @ w3d          # (D2, D2)
    mat = (p1 @ w2e) @ p3                                    # (D1, D2)
    # bias = forward(0): captures all mean terms exactly.
    bias = reference_forward(jnp.zeros((1, d1), jnp.float32), params)  # (1, D2)
    # Note: casting the fully-folded M to bf16 can lose slightly more
    # precision than staged bf16 matmuls; fine at ~5e-2 tolerance.
    return mat.astype(compute_dtype), bias.astype(jnp.float32)


# ---------------------------------------------------------------------------
# Synthetic parameters + pure-JAX reference of the original (unfolded) module.
# ---------------------------------------------------------------------------
def make_params(key, ppa1=(256, 4), pca=(256, 128), ppa2=(128, 4)):
    """PyTorch Linear(in, out) weight is (out, in); we store the transpose."""
    d1, h1 = ppa1
    d1b, d2 = pca
    d2b, h2 = ppa2
    assert d1 == d1b and d2 == d2b
    ks = jax.random.split(key, 8)
    f = jnp.float32
    return {
        "mean1": jax.random.normal(ks[0], (1, d1), f) * 0.1,
        "mean2": jax.random.normal(ks[1], (1, d1), f) * 0.1,
        "mean3": jax.random.normal(ks[2], (1, d2), f) * 0.1,
        "w1e_t": jax.random.normal(ks[3], (d1, h1), f) * (1.0 / jnp.sqrt(d1)),
        "w1d_t": jax.random.normal(ks[4], (h1, d1), f) * (1.0 / jnp.sqrt(h1)),
        "w2e_t": jax.random.normal(ks[5], (d1, d2), f) * (1.0 / jnp.sqrt(d1)),
        "w3e_t": jax.random.normal(ks[6], (d2, h2), f) * (1.0 / jnp.sqrt(d2)),
        "w3d_t": jax.random.normal(ks[7], (h2, d2), f) * (1.0 / jnp.sqrt(h2)),
    }


def reference_forward(x, p):
    x1 = x - p["mean1"]
    r1 = x1 - (x1 @ p["w1e_t"]) @ p["w1d_t"]
    x2 = r1 - p["mean2"]
    h = x2 @ p["w2e_t"]
    x3 = h - p["mean3"]
    r2 = x3 - (x3 @ p["w3e_t"]) @ p["w3d_t"]
    return r2


if __name__ == "__main__":
    key = jax.random.PRNGKey(0)
    kx, kp, kx2 = jax.random.split(key, 3)

    D1, D2 = 256, 128
    params = make_params(kp, ppa1=(D1, 4), pca=(D1, D2), ppa2=(D2, 4))

    # Fold ONCE per parameter set (hoisted out of the per-call path).
    mat_f32, bias = fold_params(params, jnp.float32)
    mat_bf16, _ = fold_params(params, jnp.bfloat16)

    run = jax.jit(dimension_reduction)

    # 1) Small-batch correctness check (f32 path, single grid step).
    B = 8
    x = jax.random.normal(kx, (B, D1), jnp.float32)
    out = jax.block_until_ready(run(x, mat_f32, bias))
    ref = reference_forward(x, params)
    assert out.shape == (B, D2)
    assert jnp.allclose(out, ref, atol=1e-4, rtol=1e-4)

    # 2) Batch not divisible by the tile or by 8: exercises the >=2-step
    #    "parallel" grid and the masked partial last output block (no
    #    jnp.pad / slice HBM round-trip anymore).
    B2 = 300
    x2 = jax.random.normal(kx2, (B2, D1), jnp.float32)
    out2 = jax.block_until_ready(run(x2, mat_f32, bias))
    ref2 = reference_forward(x2, params)
    assert out2.shape == (B2, D2)
    assert jnp.allclose(out2, ref2, atol=1e-4, rtol=1e-4)

    # 3) bf16 MXU-operand path: x is cast to bf16 in the wrapper (halves the
    #    input HBM stream), accumulation + bias + output stay f32.
    out3 = jax.block_until_ready(run(x2, mat_bf16, bias))
    assert out3.shape == (B2, D2)
    assert jnp.allclose(out3.astype(jnp.float32), ref2, atol=5e-2, rtol=5e-2)

    print("KERNEL_OK")
</pallas_src>

<mosaic_0001>
module attributes {stable_mosaic.version = 11 : i64} {
  func.func @_folded_affine_kernel(%arg0: i32, %arg1: memref<8x256xf32, #tpu.memory_space<vmem>>, %arg2: memref<256x128xf32, #tpu.memory_space<vmem>>, %arg3: memref<1x128xf32, #tpu.memory_space<vmem>>, %arg4: memref<8x128xf32, #tpu.memory_space<vmem>>) attributes {dimension_semantics = [#tpu.dimension_semantics<parallel>], iteration_bounds = array<i64: 1>, scalar_prefetch = 0 : i64, scratch_operands = 0 : i64, tpu.core_type = #tpu.core_type<tc>, window_params = [{transform_indices = @transform_0, window_bounds = array<i64: 8, 256>}, {pipeline_mode = #tpu.pipeline_mode<synchronous>, transform_indices = @transform_1, window_bounds = array<i64: 256, 128>}, {pipeline_mode = #tpu.pipeline_mode<synchronous>, transform_indices = @transform_2, window_bounds = array<i64: 1, 128>}, {transform_indices = @transform_3, window_bounds = array<i64: 8, 128>}]} {
    %c0 = arith.constant 0 : index
    %c0_0 = arith.constant 0 : index
    %0 = vector.load %arg1[%c0, %c0_0] : memref<8x256xf32, #tpu.memory_space<vmem>>, vector<8x256xf32>
    %c0_1 = arith.constant 0 : index
    %c0_2 = arith.constant 0 : index
    %1 = vector.load %arg2[%c0_1, %c0_2] : memref<256x128xf32, #tpu.memory_space<vmem>>, vector<256x128xf32>
    %cst = arith.constant dense<0.000000e+00> : vector<8x128xf32>
    %2 = tpu.matmul %0, %1, %cst {dimension_numbers = #tpu.dot_dimension_numbers<[1], [0], [0], [1], [0, 0, 1, 1], [], []>} : vector<8x256xf32>, vector<256x128xf32>, vector<8x128xf32> -> vector<8x128xf32>
    %c0_3 = arith.constant 0 : index
    %c0_4 = arith.constant 0 : index
    %3 = vector.load %arg3[%c0_3, %c0_4] : memref<1x128xf32, #tpu.memory_space<vmem>>, vector<1x128xf32>
    %4 = vector.broadcast %3 : vector<1x128xf32> to vector<8x128xf32>
    %5 = arith.addf %2, %4 : vector<8x128xf32>
    %c0_5 = arith.constant 0 : index
    %c0_6 = arith.constant 0 : index
    %6 = vector.load %arg4[%c0_5, %c0_6] : memref<8x128xf32, #tpu.memory_space<vmem>>, vector<8x128xf32>
    tpu.vector_store %arg4[%c0_5, %c0_6], %5 {strides = array<i32>} : memref<8x128xf32, #tpu.memory_space<vmem>>, vector<8x128xf32>,
    return
  }
  func.func @transform_0(%arg0: i32) -> (i32, i32) {
    %c0_i32 = arith.constant 0 : i32
    %c0_i32_0 = arith.constant 0 : i32
    return %arg0, %c0_i32 : i32, i32
  }
  func.func @transform_1(%arg0: i32) -> (i32, i32) {
    %c0_i32 = arith.constant 0 : i32
    %c0_i32_0 = arith.constant 0 : i32
    %c0_i32_1 = arith.constant 0 : i32
    return %c0_i32, %c0_i32_0 : i32, i32
  }
  func.func @transform_2(%arg0: i32) -> (i32, i32) {
    %c0_i32 = arith.constant 0 : i32
    %c0_i32_0 = arith.constant 0 : i32
    %c0_i32_1 = arith.constant 0 : i32
    return %c0_i32, %c0_i32_0 : i32, i32
  }
  func.func @transform_3(%arg0: i32) -> (i32, i32) {
    %c0_i32 = arith.constant 0 : i32
    %c0_i32_0 = arith.constant 0 : i32
    return %arg0, %c0_i32 : i32, i32
  }
}

</mosaic_0001>

<bundles_post_ra>
// kernel: dimension_reduction.1
= control target key start
LH: loop header
LB: loop body
LE: loop exit
PB: predicated region body
PF: predicated region fallthrough
CT: control target
= control target key end

     0   :  { %8 = vsyncpa [#allocation3], 0  ;;  %s385_s0 = inlined_call_operand.hbm [shape: f32[8,256], index: 0, kind: input, shape index: {}]   ;;  %s386_s1 = inlined_call_operand.hbm [shape: f32[256,128], index: 1, kind: input, shape index: {}]   ;;  %s387_s2 = inlined_call_operand.vmem [shape: f32[1,128], index: 2, kind: input, shape index: {}]   ;;  %s388_s3 = inlined_call_operand.hbm [shape: f32[8,128], index: 3, kind: output, shape index: {}]  }
   0x1   :  { %9 = vsyncpa [#allocation6], 0 }
   0x2   :  { %10 = vsyncpa [#allocation4], 0  ;;  %s314_s12 = smov [#allocation2]   ;;  %s315_s14 = smov [#allocation5]  }
   0x3   :  { %s17_s13 = sshll.u32 %s314_s12, 4  ;;  %s26_s15 = sshll.u32 %s315_s14, 4  ;;  %s18_s13 = int_to_ptr.vmem [resolvable:$true] %s17_s13  ;;  %s339_s15 = int_to_ptr.vmem [resolvable:$true] %s26_s15 }
   0x4   :  { %s242_s18 = scalar_lea.hbm %s385_s0, 256 }
   0x5   :  { %p243_p0 = scmp.ne.s32.totalorder %s385_s0, %s242_s18  ;;  %p246_p1 = scmp.lt.u32.totalorder %s242_s18, %s385_s0 }
   0x7   :  { %p248_p2 = pnand %p246_p1, %p243_p0 }
   0x9   :  { %251 = shalt.err (!%p248_p2)
}
   0xa   :  { %s252_s23 = scalar_lea.vmem %s18_s13, 256  ;;  %p257_p4 = scmp.lt.s32.totalorder %s18_s13, %s18_s13 }
   0xb   :  { %p253_p3 = scmp.ne.s32.totalorder %s18_s13, %s252_s23  ;;  %p258_p5 = scmp.lt.s32.totalorder %s252_s23, %s252_s23 }
   0xd   :  { %p259_p6 = por %p258_p5, %p257_p4 }
   0xf   :  { %p260_p7 = pnand %p259_p6, %p253_p3 }
  0x11   :  { %263 = shalt.err (!%p260_p7)
}
  0x12   :  { %20 = dma.hbm_to_vmem [thread:$0]  %s385_s0, 256, %s18_s13, [#allocation3]  }
  0x13   :  { %s264_s28 = scalar_lea.hbm %s386_s1, 4096 }
  0x14   :  { %p265_p8 = scmp.ne.s32.totalorder %s386_s1, %s264_s28  ;;  %p268_p9 = scmp.lt.u32.totalorder %s264_s28, %s386_s1 }
  0x16   :  { %p270_p10 = pnand %p268_p9, %p265_p8 }
  0x18   :  { %273 = shalt.err (!%p270_p10)
}
  0x19   :  { %s274_s6 = scalar_lea.vmem %s339_s15, 4096  ;;  %p279_p12 = scmp.lt.s32.totalorder %s339_s15, %s339_s15 }
  0x1a   :  { %p275_p11 = scmp.ne.s32.totalorder %s339_s15, %s274_s6  ;;  %p280_p13 = scmp.lt.s32.totalorder %s274_s6, %s274_s6 }
  0x1c   :  { %p281_p0 = por %p280_p13, %p279_p12 }
  0x1e   :  { %p282_p1 = pnand %p281_p0, %p275_p11 }
  0x20   :  { %285 = shalt.err (!%p282_p1)
}
  0x21   :  { %s316_s0 = smov 128   ;;  %s317_s7 = smov 8  }
  0x22   :  { %32 = dma.hbm_to_vmem [thread:$0]  %s386_s1, 4096, %s339_s15, [#allocation6], %s316_s0, %s316_s0, %s317_s7  }
  0x23   :  { %308 = dma.done.wait [#allocation3], 256  }
  0x24   :  { %309 = vsyncadd [#allocation3], 4294967040 }
  0x25   :  { %310 = dma.done.wait [#allocation6], 4096  }
  0x26   :  { %311 = vsyncadd [#allocation6], 4294963200  ;;  %v59_v0 = vld [vmem:[#allocation5 + $0x80] sm:$0xff]  ;;  %v60_v1 = vld [vmem:[#allocation5 + $0x88] sm:$0xff]  ;;  %s318_s11 = smov [#allocation7]  }
  0x27   :  { %v43_v2 = vld [vmem:[#allocation5] sm:$0xff]  ;;  %v205_v3 = vpack.c.bf16 %v60_v1, %v59_v0  ;;  %v44_v4 = vld [vmem:[#allocation5 + $0x8] sm:$0xff]  ;;  %v61_v5 = vld [vmem:[#allocation5 + $0x90] sm:$0xff]  ;;  %s159_s12 = sshll.u32 %s318_s11, 4  ;;  %s160_s12 = int_to_ptr.vmem [resolvable:$true] %s159_s12 }
  0x28   :  { %v62_v6 = vld [vmem:[#allocation5 + $0x98] sm:$0xff]  ;;  %v207_v7 = vpack.c.bf16 %v44_v4, %v43_v2  ;;  %v45_v9 = vld [vmem:[#allocation5 + $0x10] sm:$0xff]  ;;  %v63_v11 = vld [vmem:[#allocation5 + $0xa0] sm:$0xff]  ;;  %s286_s13 = scalar_lea.vmem %s160_s12, 128  ;;  %p291_p3 = scmp.lt.s32.totalorder %s160_s12, %s160_s12 }
  0x29   :  { %v209_v8 = vpack.c.bf16 %v62_v6, %v61_v5  ;;  %v46_v10 = vld [vmem:[#allocation5 + $0x18] sm:$0xff]  ;;  %206 = vmatprep.subr.bf16.mxu0 %v205_v3  ;;  %v64_v12 = vld [vmem:[#allocation5 + $0xa8] sm:$0xff]  ;;  %v47_v15 = vld [vmem:[#allocation5 + $0x20] sm:$0xff]  ;;  %p287_p2 = scmp.ne.s32.totalorder %s160_s12, %s286_s13  ;;  %p292_p4 = scmp.lt.s32.totalorder %s286_s13, %s286_s13 }
  0x2a   :  { %208 = vmatpush3.bf16.msra.mxu0 %v207_v7  ;;  %v211_v13 = vpack.c.bf16 %v46_v10, %v45_v9  ;;  %v213_v14 = vpack.c.bf16 %v64_v12, %v63_v11  ;;  %v48_v16 = vld [vmem:[#allocation5 + $0x28] sm:$0xff]  ;;  %v65_v17 = vld [vmem:[#allocation5 + $0xb0] sm:$0xff]  ;;  %v66_v18 = vld [vmem:[#allocation5 + $0xb8] sm:$0xff] }
  0x2b   :  { %210 = vmatprep.subr.bf16.mxu0 %v209_v8  ;;  %v215_v19 = vpack.c.bf16 %v48_v16, %v47_v15  ;;  %v217_v20 = vpack.c.bf16 %v66_v18, %v65_v17  ;;  %v49_v21 = vld [vmem:[#allocation5 + $0x30] sm:$0xff]  ;;  %v50_v22 = vld [vmem:[#allocation5 + $0x38] sm:$0xff]  ;;  %v67_v23 = vld [vmem:[#allocation5 + $0xc0] sm:$0xff]  ;;  %p293_p5 = por %p292_p4, %p291_p3 }
  0x2c   :  { %v68_v24 = vld [vmem:[#allocation5 + $0xc8] sm:$0xff]  ;;  %v42_v25 = vld [vmem:[#allocation2 + $0x8] sm:$0xff]  ;;  %v219_v26 = vpack.c.bf16 %v50_v22, %v49_v21  ;;  %v51_v28 = vld [vmem:[#allocation5 + $0x40] sm:$0xff] }
  0x2d   :  { %146 = vmatprep.mubr.f32.mxu0 %v42_v25  ;;  %v221_v27 = vpack.c.bf16 %v68_v24, %v67_v23  ;;  %v52_v29 = vld [vmem:[#allocation5 + $0x48] sm:$0xff]  ;;  %v69_v30 = vld [vmem:[#allocation5 + $0xd0] sm:$0xff]  ;;  %v70_v31 = vld [vmem:[#allocation5 + $0xd8] sm:$0xff]  ;;  %p294_p6 = pnand %p293_p5, %p287_p2 }
  0x2e   :  { %212 = vmatpush3.bf16.msra.mxu0 %v211_v13  ;;  %v223_v32 = vpack.c.bf16 %v52_v29, %v51_v28  ;;  %v225_v33 = vpack.c.bf16 %v70_v31, %v69_v30  ;;  %v53_v34 = vld [vmem:[#allocation5 + $0x50] sm:$0xff]  ;;  %v54_v35 = vld [vmem:[#allocation5 + $0x58] sm:$0xff]  ;;  %v71_v36 = vld [vmem:[#allocation5 + $0xe0] sm:$0xff] }
  0x2f   :  { %214 = vmatprep.subr.bf16.mxu0 %v213_v14  ;;  %v72_v37 = vld [vmem:[#allocation5 + $0xe8] sm:$0xff]  ;;  %v227_v38 = vpack.c.bf16 %v54_v35, %v53_v34  ;;  %v55_v40 = vld [vmem:[#allocation5 + $0x60] sm:$0xff]  ;;  %v73_v42 = vld [vmem:[#allocation5 + $0xf0] sm:$0xff] }
  0x30   :  { %v229_v39 = vpack.c.bf16 %v72_v37, %v71_v36  ;;  %v56_v41 = vld [vmem:[#allocation5 + $0x68] sm:$0xff]  ;;  %v74_v43 = vld [vmem:[#allocation5 + $0xf8] sm:$0xff]  ;;  %v57_v46 = vld [vmem:[#allocation5 + $0x70] sm:$0xff] }
  0x31   :  { %v231_v44 = vpack.c.bf16 %v56_v41, %v55_v40  ;;  %v233_v45 = vpack.c.bf16 %v74_v43, %v73_v42  ;;  %v58_v47 = vld [vmem:[#allocation5 + $0x78] sm:$0xff]  ;;  %v41_v49 = vld [vmem:[#allocation2] sm:$0xff] }
  0x32   :  { %216 = vmatpush3.bf16.msra.mxu0 %v215_v19  ;;  %v235_v48 = vpack.c.bf16 %v58_v47, %v57_v46  ;;  %v169_v51 = vld [vmem:[%s387_s2] ss:$0 sm:$0xff] }
  0x33   :  { %218 = vmatprep.subr.bf16.mxu0 %v217_v20 }
  0x36   :  { %220 = vmatpush3.bf16.msra.mxu0 %v219_v26 }
  0x37   :  { %222 = vmatprep.subr.bf16.mxu0 %v221_v27 }
  0x3a   :  { %224 = vmatpush3.bf16.msra.mxu0 %v223_v32 }
  0x3b   :  { %226 = vmatprep.subr.bf16.mxu0 %v225_v33 }
  0x3e   :  { %228 = vmatpush3.bf16.msra.mxu0 %v227_v38 }
  0x3f   :  { %230 = vmatprep.subr.bf16.mxu0 %v229_v39 }
  0x42   :  { %232 = vmatpush3.bf16.msra.mxu0 %v231_v44 }
  0x43   :  { %234 = vmatprep.subr.bf16.mxu0 %v233_v45 }
  0x46   :  { %236 = vmatpush3.bf16.msra.mxu0 %v235_v48 }
  0x49   :  { %147 = vmatmul.mubr.f32.vlgmr.msra.gmra.mrb[0].mxu0 %v41_v49 }
 0x11c   :  { %v202_v50 = vpop.f32.mrb[0].mxu0 }
 0x11d   :  { %v203_v52 = vpop.f32.mrb[1].mxu0 }
 0x11e   :  { %v204_v53 = vadd.f32 %v203_v52, %v202_v50 }
 0x120   :  { %v149_v54 = vadd.f32 %v204_v53, %v169_v51 }
 0x122   :  { %152 = vst [vmem:[#allocation7] sm:$0xff] %v149_v54 }
 0x123   :  { %297 = shalt.err (!%p294_p6)
}
 0x124   :  { %s298_s16 = scalar_lea.hbm %s388_s3, 128 }
 0x125   :  { %p299_p7 = scmp.ne.s32.totalorder %s388_s3, %s298_s16  ;;  %p302_p8 = scmp.lt.u32.totalorder %s298_s16, %s388_s3 }
 0x127   :  { %p304_p9 = pnand %p302_p8, %p299_p7 }
 0x129   :  { %307 = shalt.err (!%p304_p9)
}
 0x12a   :  { %162 = dma.vmem_to_hbm [thread:$0]  %s160_s12, 128, %s388_s3, [#allocation4]  }
 0x12b   :  { %312 = dma.done.wait [#allocation4], 128  }
 0x12c   :  { %313 = vsyncadd [#allocation4], 4294967168 }
 0x12d   :  { %166 = vsyncpa [#allocation3], 1 }
 0x12e   :  { %167 = vsyncpa [#allocation6], 1 }
 0x12f   :  { %168 = vsyncpa [#allocation4], 1 }

</bundles_post_ra>
